<compile_context>
chip_gen: v7x
topology: tpu7x:2x2x1
jax: 0.10.0
libtpu: 0.0.40
codegen_flags: <defaults>
</compile_context>

<pallas_src>
import jax
import jax.numpy as jnp
from jax.experimental import pallas as pl
from jax.experimental.pallas import tpu as pltpu


def _round_up(n, m):
    return (n + m - 1) // m * m


def rnn_fused_kernel(maxlen_ref,                       # SMEM (1,) int32  (scalar prefetch)
                     x_ref, len_ref,                   # (BT,TT,D), (BT,1)
                     wih_ref, b_ref, whh_ref,          # (D,Hp), (1,Hp), (Hp,Hp)  VMEM-resident
                     wfc_ref, bfc_ref,                 # (Hp,Op), (1,Op)          VMEM-resident
                     out_ref,                          # (BT, Op) output block
                     xp_sc, h_sc, sel_sc):             # scratch: (BT,TT,Hp), (BT,Hp), (BT,Hp)
    c = pl.program_id(1)                               # time-chunk index (serial)
    n_chunks = pl.num_programs(1)
    BT, TT, D = x_ref.shape
    Hp = whh_ref.shape[0]

    @pl.when(c == 0)
    def _():
        h_sc[...] = jnp.zeros_like(h_sc)
        sel_sc[...] = jnp.zeros_like(sel_sc)

    base_t = c * TT
    max_len = maxlen_ref[0]

    # Skip chunks entirely past max(lengths) (only the DMA of the x block is
    # still issued; compute + serial chain are skipped).
    @pl.when(base_t < max_len)
    def _():
        # Hoisted input projection: one tall MXU matmul per chunk, off the
        # serial critical path. x stays in (BT, TT, D) layout; no transpose.
        xc = x_ref[...]                                              # (BT, TT, D)
        xp = (jnp.dot(xc.reshape(BT * TT, D).astype(wih_ref.dtype),
                      wih_ref[...],
                      preferred_element_type=jnp.float32)
              + b_ref[...])                                          # (BT*TT, Hp) f32
        xp_sc[...] = xp.reshape(BT, TT, Hp)

        h = h_sc[...]
        sel = sel_sc[...]
        lm1 = len_ref[...] - 1                                       # (BT, 1), hoisted
        whh = whh_ref[...]
        # TT is a small static int -> fully unrolled serial recurrence.
        for t in range(TT):
            xpt = xp_sc[:, t, :]                                     # (BT, Hp)
            h = jnp.tanh(xpt + jnp.dot(h.astype(whh.dtype), whh,
                                       preferred_element_type=jnp.float32))
            sel = jnp.where(lm1 == (base_t + t), h, sel)
        h_sc[...] = h
        sel_sc[...] = sel

    # Final FC fused into the last chunk (sel_sc already holds h_{len-1}).
    @pl.when(c == n_chunks - 1)
    def _():
        out_ref[...] = (jnp.dot(sel_sc[...], wfc_ref[...],
                                preferred_element_type=jnp.float32)
                        + bfc_ref[...]).astype(out_ref.dtype)


def rnn_forward(x, lengths, params, *, time_chunk=32, batch_tile=8,
                mxu_dtype=None):
    """x: (B, T, D) float32 (batch_first, like PyTorch); lengths: (B,) int, 1<=len<=T.

    mxu_dtype: optionally jnp.bfloat16 to feed bf16 operands to the MXU on
    v6e/v7x (accumulation and all VPU/EUP work stay f32).
    """
    wih, whh, b, wfc, bfc = params          # (D,H),(H,H),(1,H),(H,O),(1,O)
    B, T, D = x.shape
    H = wih.shape[1]
    O = wfc.shape[1]

    # ---- tiling (all static; no host syncs) ---------------------------------
    Hp = _round_up(H, 128)          # lanes
    Op = _round_up(O, 128)

    if T <= time_chunk:
        TT = T                      # block dim == full dim -> always legal
    else:
        TT = max(8, (time_chunk // 8) * 8)
    Tp = _round_up(T, TT)
    n_chunks = Tp // TT

    if B <= batch_tile:
        BT = B                      # block dim == full dim -> always legal
    else:
        BT = max(8, (batch_tile // 8) * 8)
    Bp = _round_up(B, BT)
    n_btiles = Bp // BT

    # ---- padding (time & batch only; D left untouched -> no HBM inflation) --
    x_p = jnp.pad(x, ((0, Bp - B), (0, Tp - T), (0, 0)))
    len_p = jnp.pad(lengths.astype(jnp.int32), (0, Bp - B),
                    constant_values=1).reshape(Bp, 1)
    wih_p = jnp.pad(wih, ((0, 0), (0, Hp - H)))
    whh_p = jnp.pad(whh, ((0, Hp - H), (0, Hp - H)))
    b_p = jnp.pad(b, ((0, 0), (0, Hp - H)))
    wfc_p = jnp.pad(wfc, ((0, Hp - H), (0, Op - O)))
    bfc_p = jnp.pad(bfc, ((0, 0), (0, Op - O)))
    if mxu_dtype is not None:
        x_p = x_p.astype(mxu_dtype)
        wih_p = wih_p.astype(mxu_dtype)
        whh_p = whh_p.astype(mxu_dtype)

    # max(lengths) computed on-device and passed via scalar prefetch (SMEM);
    # dead chunks are skipped in-kernel -> no recompiles, no device_get.
    max_len = jnp.max(lengths).astype(jnp.int32).reshape(1)

    vmem_full = pl.BlockSpec(memory_space=pltpu.MemorySpace.VMEM)

    # NOTE: for large H (Hp >= 2048) add vmem_limit_bytes to CompilerParams so
    # the single-buffered weights + double-buffered x chunks + xp scratch fit
    # the per-generation scoped VMEM (v7x: 64 MiB physical / 32 MiB scoped).
    out_p = pl.pallas_call(
        rnn_fused_kernel,
        out_shape=jax.ShapeDtypeStruct((Bp, Op), jnp.float32),
        grid_spec=pltpu.PrefetchScalarGridSpec(
            num_scalar_prefetch=1,
            grid=(n_btiles, n_chunks),
            in_specs=[
                pl.BlockSpec((BT, TT, D), lambda bi, c, ml: (bi, c, 0)),  # x chunk
                pl.BlockSpec((BT, 1), lambda bi, c, ml: (bi, 0)),          # lengths
                vmem_full,      # W_ih^T  (whole array resident, single copy)
                vmem_full,      # b_ih + b_hh
                vmem_full,      # W_hh^T
                vmem_full,      # W_fc^T
                vmem_full,      # b_fc
            ],
            out_specs=pl.BlockSpec((BT, Op), lambda bi, c, ml: (bi, 0)),
            scratch_shapes=[
                pltpu.VMEM((BT, TT, Hp), jnp.float32),   # staged x-projection
                pltpu.VMEM((BT, Hp), jnp.float32),       # running h
                pltpu.VMEM((BT, Hp), jnp.float32),       # selected h_{len-1}
            ],
        ),
        compiler_params=pltpu.CompilerParams(
            dimension_semantics=("parallel", "arbitrary")),  # batch || , time serial
    )(max_len, x_p, len_p, wih_p, b_p, whh_p, wfc_p, bfc_p)

    return out_p[:B, :O]


def rnn_reference(x, lengths, params):
    """Pure-JAX reference mirroring the PyTorch forward."""
    wih, whh, b, wfc, bfc = params
    B = x.shape[0]
    H = wih.shape[1]

    def step(h, xt):
        h = jnp.tanh(xt @ wih + h @ whh + b)
        return h, h

    h0 = jnp.zeros((B, H), jnp.float32)
    _, hs = jax.lax.scan(step, h0, jnp.transpose(x, (1, 0, 2)))  # (T, B, H)
    hs = jnp.transpose(hs, (1, 0, 2))                             # (B, T, H)
    sel = hs[jnp.arange(B), lengths - 1]                          # (B, H)
    return sel @ wfc + bfc


def init_params(key, input_dim, hidden_dim, output_dim):
    """Deterministic init matching nn.RNN / nn.Linear shapes (values synthetic)."""
    k = 1.0 / jnp.sqrt(hidden_dim)
    ks = jax.random.split(key, 6)
    w_ih = jax.random.uniform(ks[0], (hidden_dim, input_dim), jnp.float32, -k, k)
    w_hh = jax.random.uniform(ks[1], (hidden_dim, hidden_dim), jnp.float32, -k, k)
    b_ih = jax.random.uniform(ks[2], (hidden_dim,), jnp.float32, -k, k)
    b_hh = jax.random.uniform(ks[3], (hidden_dim,), jnp.float32, -k, k)
    kf = 1.0 / jnp.sqrt(hidden_dim)
    w_fc = jax.random.uniform(ks[4], (output_dim, hidden_dim), jnp.float32, -kf, kf)
    b_fc = jax.random.uniform(ks[5], (output_dim,), jnp.float32, -kf, kf)
    # pre-transpose for row-major matmuls in the kernel
    return (w_ih.T,                              # (D, H)
            w_hh.T,                              # (H, H)
            (b_ih + b_hh).reshape(1, hidden_dim),
            w_fc.T,                              # (H, O)
            b_fc.reshape(1, output_dim))


if __name__ == "__main__":
    B, T = 2, 8
    input_dim, hidden_dim, output_dim = 4, 32, 4

    key = jax.random.PRNGKey(0)
    kx, kp = jax.random.split(key)
    x = jax.random.normal(kx, (B, T, input_dim), jnp.float32)
    lengths = jnp.array([5, 8], dtype=jnp.int32)
    params = init_params(kp, input_dim, hidden_dim, output_dim)

    out = rnn_forward(x, lengths, params)
    out = jax.block_until_ready(out)

    ref = rnn_reference(x, lengths, params)
    assert out.shape == (B, output_dim)
    assert jnp.allclose(out, ref, atol=1e-4, rtol=1e-4), (out, ref)
    print("KERNEL_OK")
</pallas_src>

<mosaic_0001>
module attributes {stable_mosaic.version = 11 : i64} {
  func.func @rnn_fused_kernel(%arg0: i32, %arg1: i32, %arg2: memref<1xi32, #tpu.memory_space<smem>>, %arg3: memref<2x8x4xf32, #tpu.memory_space<vmem>>, %arg4: memref<2x1xi32, #tpu.memory_space<vmem>>, %arg5: memref<4x128xf32, #tpu.memory_space<vmem>>, %arg6: memref<1x128xf32, #tpu.memory_space<vmem>>, %arg7: memref<128x128xf32, #tpu.memory_space<vmem>>, %arg8: memref<128x128xf32, #tpu.memory_space<vmem>>, %arg9: memref<1x128xf32, #tpu.memory_space<vmem>>, %arg10: memref<2x128xf32, #tpu.memory_space<vmem>>, %arg11: memref<2x8x128xf32, #tpu.memory_space<vmem>>, %arg12: memref<2x128xf32, #tpu.memory_space<vmem>>, %arg13: memref<2x128xf32, #tpu.memory_space<vmem>>) attributes {dimension_semantics = [#tpu.dimension_semantics<parallel>, #tpu.dimension_semantics<arbitrary>], iteration_bounds = array<i64: 1, 1>, scalar_prefetch = 1 : i64, scratch_operands = 3 : i64, tpu.core_type = #tpu.core_type<tc>, window_params = [{transform_indices = @transform_0, window_bounds = array<i64: 2, 8, 4>}, {transform_indices = @transform_1, window_bounds = array<i64: 2, 1>}, {pipeline_mode = #tpu.pipeline_mode<synchronous>, transform_indices = @transform_2, window_bounds = array<i64: 4, 128>}, {pipeline_mode = #tpu.pipeline_mode<synchronous>, transform_indices = @transform_3, window_bounds = array<i64: 1, 128>}, {pipeline_mode = #tpu.pipeline_mode<synchronous>, transform_indices = @transform_4, window_bounds = array<i64: 128, 128>}, {pipeline_mode = #tpu.pipeline_mode<synchronous>, transform_indices = @transform_5, window_bounds = array<i64: 128, 128>}, {pipeline_mode = #tpu.pipeline_mode<synchronous>, transform_indices = @transform_6, window_bounds = array<i64: 1, 128>}, {transform_indices = @transform_7, window_bounds = array<i64: 2, 128>}]} {
    %c0_i32 = arith.constant 0 : i32
    %0 = arith.cmpi eq, %arg1, %c0_i32 : i32
    %1 = arith.extui %0 : i1 to i32
    %c0_i32_0 = arith.constant 0 : i32
    %2 = arith.cmpi ne, %1, %c0_i32_0 : i32
    scf.if %2 {
      %cst = arith.constant 0.000000e+00 : f32
      %11 = vector.broadcast %cst : f32 to vector<2x128xf32>
      %c0_4 = arith.constant 0 : index
      %c0_5 = arith.constant 0 : index
      %12 = vector.load %arg12[%c0_4, %c0_5] : memref<2x128xf32, #tpu.memory_space<vmem>>, vector<2x128xf32>
      tpu.vector_store %arg12[%c0_4, %c0_5], %11 {strides = array<i32>} : memref<2x128xf32, #tpu.memory_space<vmem>>, vector<2x128xf32>,
      %cst_6 = arith.constant 0.000000e+00 : f32
      %13 = vector.broadcast %cst_6 : f32 to vector<2x128xf32>
      %c0_7 = arith.constant 0 : index
      %c0_8 = arith.constant 0 : index
      %14 = vector.load %arg13[%c0_7, %c0_8] : memref<2x128xf32, #tpu.memory_space<vmem>>, vector<2x128xf32>
      tpu.vector_store %arg13[%c0_7, %c0_8], %13 {strides = array<i32>} : memref<2x128xf32, #tpu.memory_space<vmem>>, vector<2x128xf32>,
    } else {
    }
    %c8_i32 = arith.constant 8 : i32
    %3 = arith.muli %arg1, %c8_i32 : i32
    %c0 = arith.constant 0 : index
    %4 = memref.load %arg2[%c0] : memref<1xi32, #tpu.memory_space<smem>>
    %5 = arith.cmpi slt, %3, %4 : i32
    %6 = arith.extui %5 : i1 to i32
    %c0_i32_1 = arith.constant 0 : i32
    %7 = arith.cmpi ne, %6, %c0_i32_1 : i32
    scf.if %7 {
      %c0_4 = arith.constant 0 : index
      %c0_5 = arith.constant 0 : index
      %c0_6 = arith.constant 0 : index
      %11 = vector.load %arg3[%c0_4, %c0_5, %c0_6] : memref<2x8x4xf32, #tpu.memory_space<vmem>>, vector<2x8x4xf32>
      %12 = vector.shape_cast %11 : vector<2x8x4xf32> to vector<16x4xf32>
      %c0_7 = arith.constant 0 : index
      %c0_8 = arith.constant 0 : index
      %13 = vector.load %arg5[%c0_7, %c0_8] : memref<4x128xf32, #tpu.memory_space<vmem>>, vector<4x128xf32>
      %cst = arith.constant dense<0.000000e+00> : vector<16x128xf32>
      %14 = tpu.matmul %12, %13, %cst {dimension_numbers = #tpu.dot_dimension_numbers<[1], [0], [0], [1], [0, 0, 1, 1], [], []>} : vector<16x4xf32>, vector<4x128xf32>, vector<16x128xf32> -> vector<16x128xf32>
      %c0_9 = arith.constant 0 : index
      %c0_10 = arith.constant 0 : index
      %15 = vector.load %arg6[%c0_9, %c0_10] : memref<1x128xf32, #tpu.memory_space<vmem>>, vector<1x128xf32>
      %16 = vector.broadcast %15 : vector<1x128xf32> to vector<16x128xf32>
      %17 = arith.addf %14, %16 : vector<16x128xf32>
      %18 = vector.shape_cast %17 : vector<16x128xf32> to vector<2x8x128xf32>
      %c0_11 = arith.constant 0 : index
      %c0_12 = arith.constant 0 : index
      %c0_13 = arith.constant 0 : index
      %19 = vector.load %arg11[%c0_11, %c0_12, %c0_13] : memref<2x8x128xf32, #tpu.memory_space<vmem>>, vector<2x8x128xf32>
      tpu.vector_store %arg11[%c0_11, %c0_12, %c0_13], %18 {strides = array<i32>} : memref<2x8x128xf32, #tpu.memory_space<vmem>>, vector<2x8x128xf32>,
      %c0_14 = arith.constant 0 : index
      %c0_15 = arith.constant 0 : index
      %20 = vector.load %arg12[%c0_14, %c0_15] : memref<2x128xf32, #tpu.memory_space<vmem>>, vector<2x128xf32>
      %c0_16 = arith.constant 0 : index
      %c0_17 = arith.constant 0 : index
      %21 = vector.load %arg13[%c0_16, %c0_17] : memref<2x128xf32, #tpu.memory_space<vmem>>, vector<2x128xf32>
      %c0_18 = arith.constant 0 : index
      %c0_19 = arith.constant 0 : index
      %22 = vector.load %arg4[%c0_18, %c0_19] : memref<2x1xi32, #tpu.memory_space<vmem>>, vector<2x1xi32>
      %c1_i32 = arith.constant 1 : i32
      %23 = vector.broadcast %c1_i32 : i32 to vector<2x1xi32>
      %24 = arith.subi %22, %23 : vector<2x1xi32>
      %c0_20 = arith.constant 0 : index
      %c0_21 = arith.constant 0 : index
      %25 = vector.load %arg7[%c0_20, %c0_21] : memref<128x128xf32, #tpu.memory_space<vmem>>, vector<128x128xf32>
      %c0_22 = arith.constant 0 : index
      %c0_23 = arith.constant 0 : index
      %c0_24 = arith.constant 0 : index
      %26 = vector.load %arg11[%c0_22, %c0_23, %c0_24] : memref<2x8x128xf32, #tpu.memory_space<vmem>>, vector<2x1x128xf32>
      %27 = vector.shape_cast %26 : vector<2x1x128xf32> to vector<2x128xf32>
      %cst_25 = arith.constant dense<0.000000e+00> : vector<2x128xf32>
      %28 = tpu.matmul %20, %25, %cst_25 {dimension_numbers = #tpu.dot_dimension_numbers<[1], [0], [0], [1], [0, 0, 1, 1], [], []>} : vector<2x128xf32>, vector<128x128xf32>, vector<2x128xf32> -> vector<2x128xf32>
      %29 = arith.addf %27, %28 : vector<2x128xf32>
      %30 = math.tanh %29 : vector<2x128xf32>
      %c0_i32_26 = arith.constant 0 : i32
      %31 = arith.addi %3, %c0_i32_26 : i32
      %32 = vector.broadcast %31 : i32 to vector<2x1xi32>
      %33 = arith.cmpi eq, %24, %32 : vector<2x1xi32>
      %34 = vector.shape_cast %33 : vector<2x1xi1> to vector<2x1xi1>
      %35 = vector.broadcast %34 : vector<2x1xi1> to vector<2x128xi1>
      %36 = arith.select %35, %30, %21 : vector<2x128xi1>, vector<2x128xf32>
      %c0_27 = arith.constant 0 : index
      %c1 = arith.constant 1 : index
      %c0_28 = arith.constant 0 : index
      %37 = vector.load %arg11[%c0_27, %c1, %c0_28] : memref<2x8x128xf32, #tpu.memory_space<vmem>>, vector<2x1x128xf32>
      %38 = vector.shape_cast %37 : vector<2x1x128xf32> to vector<2x128xf32>
      %cst_29 = arith.constant dense<0.000000e+00> : vector<2x128xf32>
      %39 = tpu.matmul %30, %25, %cst_29 {dimension_numbers = #tpu.dot_dimension_numbers<[1], [0], [0], [1], [0, 0, 1, 1], [], []>} : vector<2x128xf32>, vector<128x128xf32>, vector<2x128xf32> -> vector<2x128xf32>
      %40 = arith.addf %38, %39 : vector<2x128xf32>
      %41 = math.tanh %40 : vector<2x128xf32>
      %c1_i32_30 = arith.constant 1 : i32
      %42 = arith.addi %3, %c1_i32_30 : i32
      %43 = vector.broadcast %42 : i32 to vector<2x1xi32>
      %44 = arith.cmpi eq, %24, %43 : vector<2x1xi32>
      %45 = vector.shape_cast %44 : vector<2x1xi1> to vector<2x1xi1>
      %46 = vector.broadcast %45 : vector<2x1xi1> to vector<2x128xi1>
      %47 = arith.select %46, %41, %36 : vector<2x128xi1>, vector<2x128xf32>
      %c0_31 = arith.constant 0 : index
      %c2 = arith.constant 2 : index
      %c0_32 = arith.constant 0 : index
      %48 = vector.load %arg11[%c0_31, %c2, %c0_32] : memref<2x8x128xf32, #tpu.memory_space<vmem>>, vector<2x1x128xf32>
      %49 = vector.shape_cast %48 : vector<2x1x128xf32> to vector<2x128xf32>
      %cst_33 = arith.constant dense<0.000000e+00> : vector<2x128xf32>
      %50 = tpu.matmul %41, %25, %cst_33 {dimension_numbers = #tpu.dot_dimension_numbers<[1], [0], [0], [1], [0, 0, 1, 1], [], []>} : vector<2x128xf32>, vector<128x128xf32>, vector<2x128xf32> -> vector<2x128xf32>
      %51 = arith.addf %49, %50 : vector<2x128xf32>
      %52 = math.tanh %51 : vector<2x128xf32>
      %c2_i32 = arith.constant 2 : i32
      %53 = arith.addi %3, %c2_i32 : i32
      %54 = vector.broadcast %53 : i32 to vector<2x1xi32>
      %55 = arith.cmpi eq, %24, %54 : vector<2x1xi32>
      %56 = vector.shape_cast %55 : vector<2x1xi1> to vector<2x1xi1>
      %57 = vector.broadcast %56 : vector<2x1xi1> to vector<2x128xi1>
      %58 = arith.select %57, %52, %47 : vector<2x128xi1>, vector<2x128xf32>
      %c0_34 = arith.constant 0 : index
      %c3 = arith.constant 3 : index
      %c0_35 = arith.constant 0 : index
      %59 = vector.load %arg11[%c0_34, %c3, %c0_35] : memref<2x8x128xf32, #tpu.memory_space<vmem>>, vector<2x1x128xf32>
      %60 = vector.shape_cast %59 : vector<2x1x128xf32> to vector<2x128xf32>
      %cst_36 = arith.constant dense<0.000000e+00> : vector<2x128xf32>
      %61 = tpu.matmul %52, %25, %cst_36 {dimension_numbers = #tpu.dot_dimension_numbers<[1], [0], [0], [1], [0, 0, 1, 1], [], []>} : vector<2x128xf32>, vector<128x128xf32>, vector<2x128xf32> -> vector<2x128xf32>
      %62 = arith.addf %60, %61 : vector<2x128xf32>
      %63 = math.tanh %62 : vector<2x128xf32>
      %c3_i32 = arith.constant 3 : i32
      %64 = arith.addi %3, %c3_i32 : i32
      %65 = vector.broadcast %64 : i32 to vector<2x1xi32>
      %66 = arith.cmpi eq, %24, %65 : vector<2x1xi32>
      %67 = vector.shape_cast %66 : vector<2x1xi1> to vector<2x1xi1>
      %68 = vector.broadcast %67 : vector<2x1xi1> to vector<2x128xi1>
      %69 = arith.select %68, %63, %58 : vector<2x128xi1>, vector<2x128xf32>
      %c0_37 = arith.constant 0 : index
      %c4 = arith.constant 4 : index
      %c0_38 = arith.constant 0 : index
      %70 = vector.load %arg11[%c0_37, %c4, %c0_38] : memref<2x8x128xf32, #tpu.memory_space<vmem>>, vector<2x1x128xf32>
      %71 = vector.shape_cast %70 : vector<2x1x128xf32> to vector<2x128xf32>
      %cst_39 = arith.constant dense<0.000000e+00> : vector<2x128xf32>
      %72 = tpu.matmul %63, %25, %cst_39 {dimension_numbers = #tpu.dot_dimension_numbers<[1], [0], [0], [1], [0, 0, 1, 1], [], []>} : vector<2x128xf32>, vector<128x128xf32>, vector<2x128xf32> -> vector<2x128xf32>
      %73 = arith.addf %71, %72 : vector<2x128xf32>
      %74 = math.tanh %73 : vector<2x128xf32>
      %c4_i32 = arith.constant 4 : i32
      %75 = arith.addi %3, %c4_i32 : i32
      %76 = vector.broadcast %75 : i32 to vector<2x1xi32>
      %77 = arith.cmpi eq, %24, %76 : vector<2x1xi32>
      %78 = vector.shape_cast %77 : vector<2x1xi1> to vector<2x1xi1>
      %79 = vector.broadcast %78 : vector<2x1xi1> to vector<2x128xi1>
      %80 = arith.select %79, %74, %69 : vector<2x128xi1>, vector<2x128xf32>
      %c0_40 = arith.constant 0 : index
      %c5 = arith.constant 5 : index
      %c0_41 = arith.constant 0 : index
      %81 = vector.load %arg11[%c0_40, %c5, %c0_41] : memref<2x8x128xf32, #tpu.memory_space<vmem>>, vector<2x1x128xf32>
      %82 = vector.shape_cast %81 : vector<2x1x128xf32> to vector<2x128xf32>
      %cst_42 = arith.constant dense<0.000000e+00> : vector<2x128xf32>
      %83 = tpu.matmul %74, %25, %cst_42 {dimension_numbers = #tpu.dot_dimension_numbers<[1], [0], [0], [1], [0, 0, 1, 1], [], []>} : vector<2x128xf32>, vector<128x128xf32>, vector<2x128xf32> -> vector<2x128xf32>
      %84 = arith.addf %82, %83 : vector<2x128xf32>
      %85 = math.tanh %84 : vector<2x128xf32>
      %c5_i32 = arith.constant 5 : i32
      %86 = arith.addi %3, %c5_i32 : i32
      %87 = vector.broadcast %86 : i32 to vector<2x1xi32>
      %88 = arith.cmpi eq, %24, %87 : vector<2x1xi32>
      %89 = vector.shape_cast %88 : vector<2x1xi1> to vector<2x1xi1>
      %90 = vector.broadcast %89 : vector<2x1xi1> to vector<2x128xi1>
      %91 = arith.select %90, %85, %80 : vector<2x128xi1>, vector<2x128xf32>
      %c0_43 = arith.constant 0 : index
      %c6 = arith.constant 6 : index
      %c0_44 = arith.constant 0 : index
      %92 = vector.load %arg11[%c0_43, %c6, %c0_44] : memref<2x8x128xf32, #tpu.memory_space<vmem>>, vector<2x1x128xf32>
      %93 = vector.shape_cast %92 : vector<2x1x128xf32> to vector<2x128xf32>
      %cst_45 = arith.constant dense<0.000000e+00> : vector<2x128xf32>
      %94 = tpu.matmul %85, %25, %cst_45 {dimension_numbers = #tpu.dot_dimension_numbers<[1], [0], [0], [1], [0, 0, 1, 1], [], []>} : vector<2x128xf32>, vector<128x128xf32>, vector<2x128xf32> -> vector<2x128xf32>
      %95 = arith.addf %93, %94 : vector<2x128xf32>
      %96 = math.tanh %95 : vector<2x128xf32>
      %c6_i32 = arith.constant 6 : i32
      %97 = arith.addi %3, %c6_i32 : i32
      %98 = vector.broadcast %97 : i32 to vector<2x1xi32>
      %99 = arith.cmpi eq, %24, %98 : vector<2x1xi32>
      %100 = vector.shape_cast %99 : vector<2x1xi1> to vector<2x1xi1>
      %101 = vector.broadcast %100 : vector<2x1xi1> to vector<2x128xi1>
      %102 = arith.select %101, %96, %91 : vector<2x128xi1>, vector<2x128xf32>
      %c0_46 = arith.constant 0 : index
      %c7 = arith.constant 7 : index
      %c0_47 = arith.constant 0 : index
      %103 = vector.load %arg11[%c0_46, %c7, %c0_47] : memref<2x8x128xf32, #tpu.memory_space<vmem>>, vector<2x1x128xf32>
      %104 = vector.shape_cast %103 : vector<2x1x128xf32> to vector<2x128xf32>
      %cst_48 = arith.constant dense<0.000000e+00> : vector<2x128xf32>
      %105 = tpu.matmul %96, %25, %cst_48 {dimension_numbers = #tpu.dot_dimension_numbers<[1], [0], [0], [1], [0, 0, 1, 1], [], []>} : vector<2x128xf32>, vector<128x128xf32>, vector<2x128xf32> -> vector<2x128xf32>
      %106 = arith.addf %104, %105 : vector<2x128xf32>
      %107 = math.tanh %106 : vector<2x128xf32>
      %c7_i32 = arith.constant 7 : i32
      %108 = arith.addi %3, %c7_i32 : i32
      %109 = vector.broadcast %108 : i32 to vector<2x1xi32>
      %110 = arith.cmpi eq, %24, %109 : vector<2x1xi32>
      %111 = vector.shape_cast %110 : vector<2x1xi1> to vector<2x1xi1>
      %112 = vector.broadcast %111 : vector<2x1xi1> to vector<2x128xi1>
      %113 = arith.select %112, %107, %102 : vector<2x128xi1>, vector<2x128xf32>
      %c0_49 = arith.constant 0 : index
      %c0_50 = arith.constant 0 : index
      %114 = vector.load %arg12[%c0_49, %c0_50] : memref<2x128xf32, #tpu.memory_space<vmem>>, vector<2x128xf32>
      tpu.vector_store %arg12[%c0_49, %c0_50], %107 {strides = array<i32>} : memref<2x128xf32, #tpu.memory_space<vmem>>, vector<2x128xf32>,
      %c0_51 = arith.constant 0 : index
      %c0_52 = arith.constant 0 : index
      %115 = vector.load %arg13[%c0_51, %c0_52] : memref<2x128xf32, #tpu.memory_space<vmem>>, vector<2x128xf32>
      tpu.vector_store %arg13[%c0_51, %c0_52], %113 {strides = array<i32>} : memref<2x128xf32, #tpu.memory_space<vmem>>, vector<2x128xf32>,
    } else {
    }
    %c0_i32_2 = arith.constant 0 : i32
    %8 = arith.cmpi eq, %arg1, %c0_i32_2 : i32
    %9 = arith.extui %8 : i1 to i32
    %c0_i32_3 = arith.constant 0 : i32
    %10 = arith.cmpi ne, %9, %c0_i32_3 : i32
    scf.if %10 {
      %c0_4 = arith.constant 0 : index
      %c0_5 = arith.constant 0 : index
      %11 = vector.load %arg13[%c0_4, %c0_5] : memref<2x128xf32, #tpu.memory_space<vmem>>, vector<2x128xf32>
      %c0_6 = arith.constant 0 : index
      %c0_7 = arith.constant 0 : index
      %12 = vector.load %arg8[%c0_6, %c0_7] : memref<128x128xf32, #tpu.memory_space<vmem>>, vector<128x128xf32>
      %cst = arith.constant dense<0.000000e+00> : vector<2x128xf32>
      %13 = tpu.matmul %11, %12, %cst {dimension_numbers = #tpu.dot_dimension_numbers<[1], [0], [0], [1], [0, 0, 1, 1], [], []>} : vector<2x128xf32>, vector<128x128xf32>, vector<2x128xf32> -> vector<2x128xf32>
      %c0_8 = arith.constant 0 : index
      %c0_9 = arith.constant 0 : index
      %14 = vector.load %arg9[%c0_8, %c0_9] : memref<1x128xf32, #tpu.memory_space<vmem>>, vector<1x128xf32>
      %15 = vector.broadcast %14 : vector<1x128xf32> to vector<2x128xf32>
      %16 = arith.addf %13, %15 : vector<2x128xf32>
      %c0_10 = arith.constant 0 : index
      %c0_11 = arith.constant 0 : index
      %17 = vector.load %arg10[%c0_10, %c0_11] : memref<2x128xf32, #tpu.memory_space<vmem>>, vector<2x128xf32>
      tpu.vector_store %arg10[%c0_10, %c0_11], %16 {strides = array<i32>} : memref<2x128xf32, #tpu.memory_space<vmem>>, vector<2x128xf32>,
    } else {
    }
    return
  }
  func.func @transform_0(%arg0: i32, %arg1: i32, %arg2: memref<1xi32, #tpu.memory_space<smem>>) -> (i32, i32, i32) {
    %c0_i32 = arith.constant 0 : i32
    %c0_i32_0 = arith.constant 0 : i32
    return %arg0, %arg1, %c0_i32 : i32, i32, i32
  }
  func.func @transform_1(%arg0: i32, %arg1: i32, %arg2: memref<1xi32, #tpu.memory_space<smem>>) -> (i32, i32) {
    %c0_i32 = arith.constant 0 : i32
    %c0_i32_0 = arith.constant 0 : i32
    return %arg0, %c0_i32 : i32, i32
  }
  func.func @transform_2(%arg0: i32, %arg1: i32, %arg2: memref<1xi32, #tpu.memory_space<smem>>) -> (i32, i32) {
    %c0_i32 = arith.constant 0 : i32
    %c0_i32_0 = arith.constant 0 : i32
    %c0_i32_1 = arith.constant 0 : i32
    return %c0_i32, %c0_i32_0 : i32, i32
  }
  func.func @transform_3(%arg0: i32, %arg1: i32, %arg2: memref<1xi32, #tpu.memory_space<smem>>) -> (i32, i32) {
    %c0_i32 = arith.constant 0 : i32
    %c0_i32_0 = arith.constant 0 : i32
    %c0_i32_1 = arith.constant 0 : i32
    return %c0_i32, %c0_i32_0 : i32, i32
  }
  func.func @transform_4(%arg0: i32, %arg1: i32, %arg2: memref<1xi32, #tpu.memory_space<smem>>) -> (i32, i32) {
    %c0_i32 = arith.constant 0 : i32
    %c0_i32_0 = arith.constant 0 : i32
    %c0_i32_1 = arith.constant 0 : i32
    return %c0_i32, %c0_i32_0 : i32, i32
  }
  func.func @transform_5(%arg0: i32, %arg1: i32, %arg2: memref<1xi32, #tpu.memory_space<smem>>) -> (i32, i32) {
    %c0_i32 = arith.constant 0 : i32
    %c0_i32_0 = arith.constant 0 : i32
    %c0_i32_1 = arith.constant 0 : i32
    return %c0_i32, %c0_i32_0 : i32, i32
  }
  func.func @transform_6(%arg0: i32, %arg1: i32, %arg2: memref<1xi32, #tpu.memory_space<smem>>) -> (i32, i32) {
    %c0_i32 = arith.constant 0 : i32
    %c0_i32_0 = arith.constant 0 : i32
    %c0_i32_1 = arith.constant 0 : i32
    return %c0_i32, %c0_i32_0 : i32, i32
  }
  func.func @transform_7(%arg0: i32, %arg1: i32, %arg2: memref<1xi32, #tpu.memory_space<smem>>) -> (i32, i32) {
    %c0_i32 = arith.constant 0 : i32
    %c0_i32_0 = arith.constant 0 : i32
    return %arg0, %c0_i32 : i32, i32
  }
}

</mosaic_0001>

<bundles_post_ra>
// kernel: tpu_custom_call.1
= control target key start
LH: loop header
LB: loop body
LE: loop exit
PB: predicated region body
PF: predicated region fallthrough
CT: control target
= control target key end

     0   :  { %14 = vsyncpa [#allocation8], 0  ;;  %s2182_s0 = inlined_call_operand.<no memory space> [shape: s32[1], index: 0, kind: input, shape index: {}]   ;;  %s2183_s1 = inlined_call_operand.vmem [shape: f32[2,8,4], index: 1, kind: input, shape index: {}]   ;;  %s2184_s2 = inlined_call_operand.vmem [shape: s32[2,1], index: 2, kind: input, shape index: {}]   ;;  %s2185_s3 = inlined_call_operand.vmem [shape: f32[4,128], index: 3, kind: input, shape index: {}]   ;;  %s2186_s4 = inlined_call_operand.vmem [shape: f32[1,128], index: 4, kind: input, shape index: {}]   ;;  %s2187_s5 = inlined_call_operand.hbm [shape: f32[128,128], index: 5, kind: input, shape index: {}]   ;;  %s2188_s6 = inlined_call_operand.hbm [shape: f32[128,128], index: 6, kind: input, shape index: {}]   ;;  %s2189_s7 = inlined_call_operand.vmem [shape: f32[1,128], index: 7, kind: input, shape index: {}]   ;;  %s2190_s8 = inlined_call_operand.hbm [shape: f32[2,128], index: 8, kind: output, shape index: {}]  }
   0x1   :  { %15 = vsyncpa [#allocation11], 0 }
   0x2   :  { %16 = vsyncpa [#allocation9], 0  ;;  %s1873_s27 = smov [#allocation7]   ;;  %s1801_s9 = scalar_lea.hbm %s2187_s5, 2048 }
   0x3   :  { %s30_s28 = sshll.u32 %s1873_s27, 4  ;;  %p1802_p0 = scmp.ne.s32.totalorder %s2187_s5, %s1801_s9  ;;  %s31_s28 = int_to_ptr.vmem [resolvable:$true] %s30_s28 }
   0x4   :  { %p1805_p1 = scmp.lt.u32.totalorder %s1801_s9, %s2187_s5 }
   0x6   :  { %p1807_p2 = pnand %p1805_p1, %p1802_p0 }
   0x8   :  { %1810 = shalt.err (!%p1807_p2)
}
   0x9   :  { %s1811_s14 = scalar_lea.vmem %s31_s28, 2048  ;;  %p1816_p4 = scmp.lt.s32.totalorder %s31_s28, %s31_s28 }
   0xa   :  { %p1812_p3 = scmp.ne.s32.totalorder %s31_s28, %s1811_s14  ;;  %p1817_p5 = scmp.lt.s32.totalorder %s1811_s14, %s1811_s14 }
   0xc   :  { %p1818_p6 = por %p1817_p5, %p1816_p4 }
   0xe   :  { %p1819_p7 = pnand %p1818_p6, %p1812_p3 }
  0x10   :  { %1822 = shalt.err (!%p1819_p7)
}
  0x11   :  { %s1874_s15 = smov 128   ;;  %s1875_s16 = smov 8  }
  0x12   :  { %36 = dma.hbm_to_vmem [thread:$0]  %s2187_s5, 2048, %s31_s28, [#allocation8], %s1874_s15, %s1874_s15, %s1875_s16  }
  0x13   :  { %s1876_s19 = smov [#allocation10]   ;;  %s1823_s23 = scalar_lea.hbm %s2188_s6, 2048 }
  0x14   :  { %s42_s20 = sshll.u32 %s1876_s19, 4  ;;  %p1824_p8 = scmp.ne.s32.totalorder %s2188_s6, %s1823_s23  ;;  %s43_s20 = int_to_ptr.vmem [resolvable:$true] %s42_s20 }
  0x15   :  { %p1827_p9 = scmp.lt.u32.totalorder %s1823_s23, %s2188_s6 }
  0x17   :  { %p1829_p10 = pnand %p1827_p9, %p1824_p8 }
  0x19   :  { %1832 = shalt.err (!%p1829_p10)
}
  0x1a   :  { %s1833_s29 = scalar_lea.vmem %s43_s20, 2048  ;;  %p1838_p12 = scmp.lt.s32.totalorder %s43_s20, %s43_s20 }
  0x1b   :  { %p1834_p11 = scmp.ne.s32.totalorder %s43_s20, %s1833_s29  ;;  %p1839_p13 = scmp.lt.s32.totalorder %s1833_s29, %s1833_s29 }
  0x1d   :  { %p1840_p0 = por %p1839_p13, %p1838_p12 }
  0x1f   :  { %p1841_p1 = pnand %p1840_p0, %p1834_p11 }
  0x21   :  { %1844 = shalt.err (!%p1841_p1)
}
  0x22   :  { %48 = dma.hbm_to_vmem [thread:$0]  %s2188_s6, 2048, %s43_s20, [#allocation11], %s1874_s15, %s1874_s15, %s1875_s16  }
  0x23   :  { %1867 = dma.done.wait [#allocation8], 2048  }
  0x24   :  { %1868 = vsyncadd [#allocation8], 4294965248 }
  0x25   :  { %1869 = dma.done.wait [#allocation11], 2048  }
  0x26   :  { %1870 = vsyncadd [#allocation11], 4294965248  ;;  %v1877_v0 = vmov 0.0   ;;  %p1056_p2 = scmp.le.s32.totalorder %s2182_s0, 0 }
  0x27   :  { %61 = vst [vmem:[#allocation3] sm:$0x3] %v1877_v0  ;;  %62 = vst [vmem:[#allocation4] sm:$0x3] %v1877_v0  ;;  %v171_v1 = vld [vmem:[#allocation7] sm:$0xff] (!%p1056_p2)  ;;  %v172_v2 = vld [vmem:[#allocation7 + $0x8] sm:$0xff] (!%p1056_p2) }
  0x28   :  { %68 = sbr.rel (%p1056_p2) target bundleno = 1916 (0x77c), region = 45  ;;  %v173_v3 = vld [vmem:[#allocation7 + $0x10] sm:$0xff] (!%p1056_p2)  ;;  %vm86_vm0 = vcmask (!%p1056_p2), 1043456   ;;  %v1878_v4 = vmov (!%p1056_p2), 0.0|0.0   ;;  %v1960_v5 = vpack.c.bf16 (!%p1056_p2), %v172_v2, %v171_v1  ;;  %v174_v6 = vld [vmem:[#allocation7 + $0x18] sm:$0xff] (!%p1056_p2)  ;;  %vm79_vm1 = vcmask (!%p1056_p2), 31744  }
  0x29   :  { %1539 = vmatprep.subr.bf16.mxu1 (!%p1056_p2), %v1878_v4  ;;  %vm1879_vm2 = vmmov (!%p1056_p2), 0   ;;  %v1880_v7 = vmov (!%p1056_p2), 0.0   ;;  %v1881_v8 = vmov (!%p1056_p2), 0   ;;  %v1966_v9 = vpack.c.bf16 (!%p1056_p2), %v174_v6, %v173_v3  ;;  %v71_v10 = vld [vmem:[%s2185_s3] sm:$0xf] (!%p1056_p2)  ;;  %v175_v12 = vld [vmem:[#allocation7 + $0x20] sm:$0xff] (!%p1056_p2) }
  0x2a   :  { %1256 = vmatprep.mubr.msk.f32.mxu1 (!%p1056_p2), %vm1879_vm2, %v1880_v7  ;;  %1767 = vset.pattern.permute.xlu0 (!%p1056_p2), %v1881_v8  ;;  %v69_v11 = vld [vmem:[%s2183_s1] sm:$0xff] (!%p1056_p2)  ;;  %v70_v14 = vld [vmem:[%s2183_s1 + $0x8] sm:$0xff] (!%p1056_p2)  ;;  %v179_v22 = vld [vmem:[#allocation7 + $0x40] sm:$0xff] (!%p1056_p2)  ;;  %vm277_vm5 = vcmask (!%p1056_p2), 1041409  }
  0x2b   :  { %1541 = vmatpush3.bf16.msra.mxu1 (!%p1056_p2), %v1960_v5  ;;  %1768 = vset.pattern.permute.xlu1 (!%p1056_p2), %v1881_v8  ;;  %v176_v13 = vld [vmem:[#allocation7 + $0x28] sm:$0xff] (!%p1056_p2)  ;;  %v177_v18 = vld [vmem:[#allocation7 + $0x30] sm:$0xff] (!%p1056_p2)  ;;  %v178_v19 = vld [vmem:[#allocation7 + $0x38] sm:$0xff] (!%p1056_p2) }
  0x2c   :  { %1542 = vmatprep.subr.bf16.mxu1 (!%p1056_p2), %v1878_v4  ;;  %1219 = vmatprep.subr.msk.mxu0 (!%p1056_p2), %vm86_vm0, %v71_v10  ;;  %v169_v15 = vld [vmem:[%s2184_s2] sm:$0x3] (!%p1056_p2)  ;;  %v1988_v16 = vpack.c.bf16 (!%p1056_p2), %v176_v13, %v175_v12  ;;  %v2000_v21 = vpack.c.bf16 (!%p1056_p2), %v178_v19, %v177_v18  ;;  %v181_v25 = vld [vmem:[#allocation7 + $0x50] sm:$0xff] (!%p1056_p2)  ;;  %v182_v26 = vld [vmem:[#allocation7 + $0x58] sm:$0xff] (!%p1056_p2) }
  0x2d   :  { %1220 = vmatpush3.msk.msra.mxu0 (!%p1056_p2), %vm86_vm0, %v71_v10  ;;  %1221 = vmatprep.mubr.msk.f32.mxu0 (!%p1056_p2), %vm79_vm1, %v69_v11  ;;  %v1990_v17 = vadd.s32 (!%p1056_p2), 4294967295, %v169_v15  ;;  %v180_v23 = vld [vmem:[#allocation7 + $0x48] sm:$0xff] (!%p1056_p2)  ;;  %v2012_v27 = vpack.c.bf16 (!%p1056_p2), %v182_v26, %v181_v25  ;;  %v183_v28 = vld [vmem:[#allocation7 + $0x60] sm:$0xff] (!%p1056_p2)  ;;  %v185_v31 = vld [vmem:[#allocation7 + $0x70] sm:$0xff] (!%p1056_p2) }
  0x2e   :  { %1222 = vmatmul.mubr.msk.f32.vlgmr.msra.gmra.mrb[0].mxu0 (!%p1056_p2), %vm79_vm1, %v70_v14  ;;  %1563 = vmatprep.subr.bf16.mxu0 (!%p1056_p2), %v1878_v4  ;;  %v2006_v24 = vpack.c.bf16 (!%p1056_p2), %v180_v23, %v179_v22  ;;  %v184_v29 = vld [vmem:[#allocation7 + $0x68] sm:$0xff] (!%p1056_p2)  ;;  %v186_v32 = vld [vmem:[#allocation7 + $0x78] sm:$0xff] (!%p1056_p2) }
  0x2f   :  { %1544 = vmatpush3.bf16.msra.mxu1 %v1966_v9  ;;  %1565 = vmatpush3.bf16.msra.mxu0 %v1960_v5  ;;  %vm268_vm3 = vcmp.eq.s32.totalorder %v1990_v17, 0  ;;  %v2018_v30 = vpack.c.bf16 %v184_v29, %v183_v28  ;;  %v2024_v33 = vpack.c.bf16 %v186_v32, %v185_v31  ;;  %v167_v34 = vld [vmem:[#allocation3] sm:$0x3]  ;;  %vm363_vm4 = vcmp.eq.s32.totalorder %v1990_v17, 1  ;;  %v1057_v36 = vld [vmem:[%s2186_s4] ss:$0 sm:$0xff] }
  0x30   :  { %1545 = vmatprep.subr.bf16.mxu1 %v1878_v4  ;;  %1566 = vmatprep.subr.bf16.mxu0 %v1878_v4  ;;  %v269_v20 = vsel %vm268_vm3, 1, %v1881_v8  ;;  %v364_v35 = vsel %vm363_vm4, 1, %v1881_v8  ;;  %vm457_vm6 = vcmp.eq.s32.totalorder %v1990_v17, 2  ;;  %v168_v63 = vld [vmem:[#allocation4] sm:$0x3]  ;;  %vm551_vm9 = vcmp.eq.s32.totalorder %v1990_v17, 3 }
  0x31   :  { %1291 = vmatprep.mubr.msk.f32.mxu0 %vm1879_vm2, %v1880_v7  ;;  %271 = vperm.xlu0 %1767, %v269_v20   ;;  %v458_v52 = vsel %vm457_vm6, 1, %v1881_v8  ;;  %v552_v11 = vsel %vm551_vm9, 1, %v1881_v8  ;;  %vm645_vm11 = vcmp.eq.s32.totalorder %v1990_v17, 4  ;;  %vm739_vm13 = vcmp.eq.s32.totalorder %v1990_v17, 5 }
  0x32   :  { %460 = vperm.xlu1 %1768, %v458_v52   ;;  %v646_v31 = vsel %vm645_vm11, 1, %v1881_v8  ;;  %vm833_vm15 = vcmp.eq.s32.totalorder %v1990_v17, 6  ;;  %vm927_vm1 = vcmp.eq.s32.totalorder %v1990_v17, 7 }
  0x33   :  { %1547 = vmatpush3.bf16.msra.mxu1 %v1988_v16  ;;  %1568 = vmatpush3.bf16.msra.mxu0 %v1966_v9 }
  0x34   :  { %1548 = vmatprep.subr.bf16.mxu1 %v1878_v4  ;;  %1569 = vmatprep.subr.bf16.mxu0 %v1878_v4 }
  0x35   :  { %366 = vperm.xlu0 %1767, %v364_v35  }
  0x36   :  { %554 = vperm.xlu1 %1768, %v552_v11  }
  0x37   :  { %1550 = vmatpush3.bf16.msra.mxu1 %v2000_v21  ;;  %1571 = vmatpush3.bf16.msra.mxu0 %v1988_v16 }
  0x38   :  { %1551 = vmatprep.subr.bf16.mxu1 %v1878_v4  ;;  %1572 = vmatprep.subr.bf16.mxu0 %v1878_v4 }
  0x39   :  { %648 = vperm.xlu0 %1767, %v646_v31  }
  0x3b   :  { %1553 = vmatpush3.bf16.msra.mxu1 %v2006_v24  ;;  %1574 = vmatpush3.bf16.msra.mxu0 %v2000_v21 }
  0x3c   :  { %1554 = vmatprep.subr.bf16.mxu1 %v1878_v4  ;;  %1575 = vmatprep.subr.bf16.mxu0 %v1878_v4 }
  0x3f   :  { %1556 = vmatpush3.bf16.msra.mxu1 %v2012_v27  ;;  %1577 = vmatpush3.bf16.msra.mxu0 %v2006_v24 }
  0x40   :  { %1557 = vmatprep.subr.bf16.mxu1 %v1878_v4  ;;  %1578 = vmatprep.subr.bf16.mxu0 %v1878_v4 }
  0x43   :  { %1559 = vmatpush3.bf16.msra.mxu1 %v2018_v30  ;;  %1580 = vmatpush3.bf16.msra.mxu0 %v2012_v27 }
  0x44   :  { %1560 = vmatprep.subr.bf16.mxu1 %v1878_v4  ;;  %1581 = vmatprep.subr.bf16.mxu0 %v1878_v4 }
  0x47   :  { %1562 = vmatpush3.bf16.msra.mxu1 %v2024_v33  ;;  %1583 = vmatpush3.bf16.msra.mxu0 %v2018_v30 }
  0x48   :  { %1587 = vmatprep.subr.bf16.mxu1 %v1878_v4  ;;  %1584 = vmatprep.subr.bf16.mxu0 %v1878_v4 }
  0x4a   :  { %1257 = vmatmul.mubr.f32.vlgmr.msra.gmra.mrb[0].mxu1 %v167_v34 }
  0x4b   :  { %1589 = vmatpush3.bf16.msra.mxu1 %v1960_v5  ;;  %1326 = vmatprep.mubr.msk.f32.mxu1 %vm1879_vm2, %v1880_v7 }
  0x4c   :  { %1586 = vmatpush3.bf16.msra.mxu0 %v2024_v33  ;;  %1590 = vmatprep.subr.bf16.mxu1 %v1878_v4 }
  0x4d   :  { %1611 = vmatprep.subr.bf16.mxu0 %v1878_v4 }
  0x4f   :  { %1592 = vmatpush3.bf16.msra.mxu1 %v1966_v9 }
  0x50   :  { %1593 = vmatprep.subr.bf16.mxu1 %v1878_v4 }
  0x53   :  { %1595 = vmatpush3.bf16.msra.mxu1 %v1988_v16 }
  0x54   :  { %1596 = vmatprep.subr.bf16.mxu1 %v1878_v4 }
  0x57   :  { %1598 = vmatpush3.bf16.msra.mxu1 %v2000_v21 }
  0x58   :  { %1599 = vmatprep.subr.bf16.mxu1 %v1878_v4 }
  0x5b   :  { %1601 = vmatpush3.bf16.msra.mxu1 %v2006_v24 }
  0x5c   :  { %1602 = vmatprep.subr.bf16.mxu1 %v1878_v4 }
  0x5f   :  { %1604 = vmatpush3.bf16.msra.mxu1 %v2012_v27 }
  0x60   :  { %1605 = vmatprep.subr.bf16.mxu1 %v1878_v4 }
  0x63   :  { %1607 = vmatpush3.bf16.msra.mxu1 %v2018_v30 }
  0x64   :  { %1608 = vmatprep.subr.bf16.mxu1 %v1878_v4 }
  0x67   :  { %1610 = vmatpush3.bf16.msra.mxu1 %v2024_v33 }
  0x68   :  { %1635 = vmatprep.subr.bf16.mxu1 %v1878_v4 }
  0xb0   :  { %v272_v60 = vpop.permute.xlu0 %271 }
  0xb1   :  { %vm273_vm7 = vcmp.eq.s32.totalorder %v272_v60, 1  ;;  %v461_v22 = vpop.permute.xlu1 %460 }
  0xb2   :  { %vm462_vm10 = vcmp.eq.s32.totalorder %v461_v22, 1 }
  0xb4   :  { %v367_v61 = vpop.permute.xlu0 %366 }
  0xb5   :  { %vm368_vm8 = vcmp.eq.s32.totalorder %v367_v61, 1 }
 0x101   :  { %v1223_v37 = vpop.f32.mrb[0].mxu0 }
 0x102   :  { %v162_v38 = vadd.f32 %v1223_v37, %v1057_v36  ;;  %v156_v39 = vpop.f32.mrb[1].mxu0 }
 0x103   :  { %v157_v40 = vadd.f32 %v1057_v36, %v156_v39 }
 0x104   :  { %166 = vst [vmem:[#allocation2 + $0x8] sm:$0xff] %v162_v38 }
 0x105   :  { %165 = vst [vmem:[#allocation2] sm:$0xff] %v157_v40  ;;  %v555_v40 = vpop.permute.xlu1 %554 }
 0x106   :  { %vm556_vm12 = vcmp.eq.s32.totalorder %v555_v40, 1 }
 0x10b   :  { %v188_v42 = vld [vmem:[#allocation2 + $0x8] sm:$0x1]  ;;  %v282_v57 = vld [vmem:[#allocation2 + $0x9] sm:$0x1]  ;;  %v376_v18 = vld [vmem:[#allocation2 + $0xa] sm:$0x1] }
 0x10c   :  { %v187_v41 = vld [vmem:[#allocation2] sm:$0x1]  ;;  %v281_v56 = vld [vmem:[#allocation2 + $0x1] sm:$0x1]  ;;  %v375_v15 = vld [vmem:[#allocation2 + $0x2] sm:$0x1] }
 0x10d   :  { %v469_v36 = vld [vmem:[#allocation2 + $0x3] sm:$0x1]  ;;  %v470_v37 = vld [vmem:[#allocation2 + $0xb] sm:$0x1]  ;;  %v752_v11 = vld [vmem:[#allocation2 + $0xe] sm:$0x1] }
 0x11d   :  { %v255_v43 = vpop.f32.mrb[0].mxu1 }
 0x11e   :  { %v260_v44 = vrot.slane %v255_v43, 1  ;;  %v1258_v45 = vpop.f32.mrb[1].mxu1  ;;  %v263_v46 = vadd.f32 %v255_v43, %v187_v41 }
 0x120   :  { %v264_v47 = vadd.f32 %v260_v44, %v188_v42 }
 0x122   :  { %1769 = vtanh.f32 %v264_v47 }
 0x123   :  { %1771 = vtanh.f32 %v263_v46  ;;  %v740_v46 = vsel %vm739_vm13, 1, %v1881_v8 }
 0x124   :  { %742 = vperm.xlu1 %1768, %v740_v46  }
 0x12c   :  { %v1770_v48 = vpop.eup %1769 }
 0x12d   :  { %v276_v49 = vrot.slane %v1770_v48, 7  ;;  %v1772_v50 = vpop.eup %1771 }
 0x12f   :  { %v278_v51 = vsel %vm277_vm5, %v276_v49, %v1772_v50  ;;  %v563_v50 = vld [vmem:[#allocation2 + $0x4] sm:$0x1] }
 0x130   :  { %1292 = vmatmul.mubr.f32.vlgmr.msra.gmra.mrb[2].mxu0 %v278_v51  ;;  %v280_v3 = vsel %vm273_vm7, %v278_v51, %v168_v63  ;;  %v564_v51 = vld [vmem:[#allocation2 + $0xc] sm:$0x1] }
 0x131   :  { %1613 = vmatpush3.bf16.msra.mxu0 %v1960_v5  ;;  %1361 = vmatprep.mubr.msk.f32.mxu0 %vm1879_vm2, %v1880_v7 }
 0x132   :  { %1614 = vmatprep.subr.bf16.mxu0 %v1878_v4 }
 0x135   :  { %1616 = vmatpush3.bf16.msra.mxu0 %v1966_v9 }
 0x136   :  { %1617 = vmatprep.subr.bf16.mxu0 %v1878_v4 }
 0x139   :  { %1619 = vmatpush3.bf16.msra.mxu0 %v1988_v16 }
 0x13a   :  { %1620 = vmatprep.subr.bf16.mxu0 %v1878_v4 }
 0x13d   :  { %1622 = vmatpush3.bf16.msra.mxu0 %v2000_v21 }
 0x13e   :  { %1623 = vmatprep.subr.bf16.mxu0 %v1878_v4 }
 0x141   :  { %1625 = vmatpush3.bf16.msra.mxu0 %v2006_v24 }
 0x142   :  { %1626 = vmatprep.subr.bf16.mxu0 %v1878_v4 }
 0x145   :  { %1628 = vmatpush3.bf16.msra.mxu0 %v2012_v27 }
 0x146   :  { %1629 = vmatprep.subr.bf16.mxu0 %v1878_v4 }
 0x149   :  { %1631 = vmatpush3.bf16.msra.mxu0 %v2018_v30 }
 0x14a   :  { %1632 = vmatprep.subr.bf16.mxu0 %v1878_v4 }
 0x14d   :  { %1634 = vmatpush3.bf16.msra.mxu0 %v2024_v33 }
 0x14e   :  { %1659 = vmatprep.subr.bf16.mxu0 %v1878_v4 }
 0x1a3   :  { %v743_v61 = vpop.permute.xlu1 %742 }
 0x1a4   :  { %vm744_vm0 = vcmp.eq.s32.totalorder %v743_v61, 1 }
 0x203   :  { %v349_v53 = vpop.f32.mrb[2].mxu0 }
 0x204   :  { %v354_v54 = vrot.slane %v349_v53, 1  ;;  %v1293_v55 = vpop.f32.mrb[3].mxu0  ;;  %v357_v58 = vadd.f32 %v349_v53, %v281_v56 }
 0x206   :  { %v358_v59 = vadd.f32 %v354_v54, %v282_v57  ;;  %v649_v54 = vpop.permute.xlu0 %648 }
 0x207   :  { %vm650_vm14 = vcmp.eq.s32.totalorder %v649_v54, 1 }
 0x208   :  { %1773 = vtanh.f32 %v358_v59 }
 0x209   :  { %1775 = vtanh.f32 %v357_v58 }
 0x212   :  { %v1774_v62 = vpop.eup %1773 }
 0x213   :  { %v371_v1 = vrot.slane %v1774_v62, 7  ;;  %v1776_v2 = vpop.eup %1775 }
 0x215   :  { %v372_v6 = vsel %vm277_vm5, %v371_v1, %v1776_v2  ;;  %v928_v1 = vsel %vm927_vm1, 1, %v1881_v8 }
 0x216   :  { %v374_v10 = vsel %vm368_vm8, %v372_v6, %v280_v3  ;;  %1327 = vmatmul.mubr.f32.vlgmr.msra.gmra.mrb[2].mxu1 %v372_v6  ;;  %930 = vperm.xlu1 %1768, %v928_v1  }
 0x217   :  { %1637 = vmatpush3.bf16.msra.mxu1 %v1960_v5  ;;  %1396 = vmatprep.mubr.msk.f32.mxu1 %vm1879_vm2, %v1880_v7 }
 0x218   :  { %1638 = vmatprep.subr.bf16.mxu1 %v1878_v4 }
 0x21b   :  { %1640 = vmatpush3.bf16.msra.mxu1 %v1966_v9 }
 0x21c   :  { %1641 = vmatprep.subr.bf16.mxu1 %v1878_v4 }
 0x21f   :  { %1643 = vmatpush3.bf16.msra.mxu1 %v1988_v16 }
 0x220   :  { %1644 = vmatprep.subr.bf16.mxu1 %v1878_v4 }
 0x223   :  { %1646 = vmatpush3.bf16.msra.mxu1 %v2000_v21 }
 0x224   :  { %1647 = vmatprep.subr.bf16.mxu1 %v1878_v4 }
 0x227   :  { %1649 = vmatpush3.bf16.msra.mxu1 %v2006_v24 }
 0x228   :  { %1650 = vmatprep.subr.bf16.mxu1 %v1878_v4 }
 0x22b   :  { %1652 = vmatpush3.bf16.msra.mxu1 %v2012_v27 }
 0x22c   :  { %1653 = vmatprep.subr.bf16.mxu1 %v1878_v4 }
 0x22f   :  { %1655 = vmatpush3.bf16.msra.mxu1 %v2018_v30 }
 0x230   :  { %1656 = vmatprep.subr.bf16.mxu1 %v1878_v4 }
 0x233   :  { %1658 = vmatpush3.bf16.msra.mxu1 %v2024_v33 }
 0x234   :  { %1683 = vmatprep.subr.bf16.mxu1 %v1878_v4 }
 0x2e9   :  { %v443_v12 = vpop.f32.mrb[2].mxu1 }
 0x2ea   :  { %v448_v13 = vrot.slane %v443_v12, 1  ;;  %v1328_v14 = vpop.f32.mrb[3].mxu1  ;;  %v451_v19 = vadd.f32 %v443_v12, %v375_v15 }
 0x2ec   :  { %v452_v20 = vadd.f32 %v448_v13, %v376_v18 }
 0x2ee   :  { %1777 = vtanh.f32 %v452_v20 }
 0x2ef   :  { %1779 = vtanh.f32 %v451_v19 }
 0x2f8   :  { %v1778_v23 = vpop.eup %1777 }
 0x2f9   :  { %v465_v25 = vrot.slane %v1778_v23, 7  ;;  %v1780_v26 = vpop.eup %1779 }
 0x2fb   :  { %v466_v28 = vsel %vm277_vm5, %v465_v25, %v1780_v26  ;;  %v845_v25 = vld [vmem:[#allocation2 + $0x7] sm:$0x1]  ;;  %v846_v26 = vld [vmem:[#allocation2 + $0xf] sm:$0x1] }
 0x2fc   :  { %v468_v29 = vsel %vm462_vm10, %v466_v28, %v374_v10  ;;  %1362 = vmatmul.mubr.f32.vlgmr.msra.gmra.mrb[4].mxu0 %v466_v28  ;;  %v751_v10 = vld [vmem:[#allocation2 + $0x6] sm:$0x1] }
 0x2fd   :  { %1661 = vmatpush3.bf16.msra.mxu0 %v1960_v5  ;;  %1431 = vmatprep.mubr.msk.f32.mxu0 %vm1879_vm2, %v1880_v7 }
 0x2fe   :  { %1662 = vmatprep.subr.bf16.mxu0 %v1878_v4 }
 0x301   :  { %1664 = vmatpush3.bf16.msra.mxu0 %v1966_v9 }
 0x302   :  { %1665 = vmatprep.subr.bf16.mxu0 %v1878_v4 }
 0x305   :  { %1667 = vmatpush3.bf16.msra.mxu0 %v1988_v16 }
 0x306   :  { %1668 = vmatprep.subr.bf16.mxu0 %v1878_v4 }
 0x309   :  { %1670 = vmatpush3.bf16.msra.mxu0 %v2000_v21 }
 0x30a   :  { %1671 = vmatprep.subr.bf16.mxu0 %v1878_v4 }
 0x30d   :  { %1673 = vmatpush3.bf16.msra.mxu0 %v2006_v24 }
 0x30e   :  { %1674 = vmatprep.subr.bf16.mxu0 %v1878_v4 }
 0x311   :  { %1676 = vmatpush3.bf16.msra.mxu0 %v2012_v27 }
 0x312   :  { %1677 = vmatprep.subr.bf16.mxu0 %v1878_v4 }
 0x315   :  { %1679 = vmatpush3.bf16.msra.mxu0 %v2018_v30 }
 0x316   :  { %1680 = vmatprep.subr.bf16.mxu0 %v1878_v4 }
 0x319   :  { %1682 = vmatpush3.bf16.msra.mxu0 %v2024_v33 }
 0x31a   :  { %1707 = vmatprep.subr.bf16.mxu0 %v1878_v4 }
 0x3cf   :  { %v537_v32 = vpop.f32.mrb[4].mxu0 }
 0x3d0   :  { %v542_v34 = vrot.slane %v537_v32, 1  ;;  %v1363_v35 = vpop.f32.mrb[5].mxu0  ;;  %v545_v38 = vadd.f32 %v537_v32, %v469_v36  ;;  %v931_v32 = vpop.permute.xlu1 %930 }
 0x3d1   :  { %vm932_vm3 = vcmp.eq.s32.totalorder %v931_v32, 1 }
 0x3d2   :  { %v546_v39 = vadd.f32 %v542_v34, %v470_v37 }
 0x3d4   :  { %1781 = vtanh.f32 %v546_v39 }
 0x3d5   :  { %1783 = vtanh.f32 %v545_v38 }
 0x3de   :  { %v1782_v41 = vpop.eup %1781 }
 0x3df   :  { %v559_v42 = vrot.slane %v1782_v41, 7  ;;  %v1784_v43 = vpop.eup %1783 }
 0x3e1   :  { %v560_v44 = vsel %vm277_vm5, %v559_v42, %v1784_v43 }
 0x3e2   :  { %v562_v45 = vsel %vm556_vm12, %v560_v44, %v468_v29  ;;  %1397 = vmatmul.mubr.f32.vlgmr.msra.gmra.mrb[4].mxu1 %v560_v44 }
 0x3e3   :  { %1685 = vmatpush3.bf16.msra.mxu1 %v1960_v5  ;;  %1466 = vmatprep.mubr.msk.f32.mxu1 %vm1879_vm2, %v1880_v7 }
 0x3e4   :  { %1686 = vmatprep.subr.bf16.mxu1 %v1878_v4 }
 0x3e7   :  { %1688 = vmatpush3.bf16.msra.mxu1 %v1966_v9 }
 0x3e8   :  { %1689 = vmatprep.subr.bf16.mxu1 %v1878_v4 }
 0x3eb   :  { %1691 = vmatpush3.bf16.msra.mxu1 %v1988_v16 }
 0x3ec   :  { %1692 = vmatprep.subr.bf16.mxu1 %v1878_v4 }
 0x3ef   :  { %1694 = vmatpush3.bf16.msra.mxu1 %v2000_v21 }
 0x3f0   :  { %1695 = vmatprep.subr.bf16.mxu1 %v1878_v4 }
 0x3f3   :  { %1697 = vmatpush3.bf16.msra.mxu1 %v2006_v24 }
 0x3f4   :  { %1698 = vmatprep.subr.bf16.mxu1 %v1878_v4 }
 0x3f7   :  { %1700 = vmatpush3.bf16.msra.mxu1 %v2012_v27 }
 0x3f8   :  { %1701 = vmatprep.subr.bf16.mxu1 %v1878_v4 }
 0x3fb   :  { %1703 = vmatpush3.bf16.msra.mxu1 %v2018_v30 }
 0x3fc   :  { %1704 = vmatprep.subr.bf16.mxu1 %v1878_v4 }
 0x3ff   :  { %1706 = vmatpush3.bf16.msra.mxu1 %v2024_v33 }
 0x4b5   :  { %v631_v47 = vpop.f32.mrb[4].mxu1 }
 0x4b6   :  { %v636_v48 = vrot.slane %v631_v47, 1  ;;  %v1398_v49 = vpop.f32.mrb[5].mxu1  ;;  %v639_v52 = vadd.f32 %v631_v47, %v563_v50 }
 0x4b8   :  { %v640_v53 = vadd.f32 %v636_v48, %v564_v51 }
 0x4ba   :  { %1785 = vtanh.f32 %v640_v53 }
 0x4bb   :  { %1787 = vtanh.f32 %v639_v52 }
 0x4c4   :  { %v1786_v55 = vpop.eup %1785 }
 0x4c5   :  { %v653_v56 = vrot.slane %v1786_v55, 7  ;;  %v1788_v57 = vpop.eup %1787 }
 0x4c7   :  { %v654_v58 = vsel %vm277_vm5, %v653_v56, %v1788_v57 }
 0x4c8   :  { %v656_v59 = vsel %vm650_vm14, %v654_v58, %v562_v45  ;;  %1432 = vmatmul.mubr.f32.vlgmr.msra.gmra.mrb[6].mxu0 %v654_v58 }
 0x4c9   :  { %1709 = vmatpush3.bf16.msra.mxu0 %v1960_v5  ;;  %1501 = vmatprep.mubr.msk.f32.mxu0 %vm1879_vm2, %v1880_v7  ;;  %v834_v5 = vsel %vm833_vm15, 1, %v1881_v8 }
 0x4ca   :  { %1710 = vmatprep.subr.bf16.mxu0 %v1878_v4  ;;  %836 = vperm.xlu0 %1767, %v834_v5  }
 0x4cd   :  { %1712 = vmatpush3.bf16.msra.mxu0 %v1966_v9 }
 0x4ce   :  { %1713 = vmatprep.subr.bf16.mxu0 %v1878_v4 }
 0x4d1   :  { %1715 = vmatpush3.bf16.msra.mxu0 %v1988_v16 }
 0x4d2   :  { %1716 = vmatprep.subr.bf16.mxu0 %v1878_v4 }
 0x4d5   :  { %1718 = vmatpush3.bf16.msra.mxu0 %v2000_v21  ;;  %v657_v21 = vld [vmem:[#allocation2 + $0x5] sm:$0x1] }
 0x4d6   :  { %1719 = vmatprep.subr.bf16.mxu0 %v1878_v4 }
 0x4d9   :  { %1721 = vmatpush3.bf16.msra.mxu0 %v2006_v24  ;;  %v658_v24 = vld [vmem:[#allocation2 + $0xd] sm:$0x1] }
 0x4da   :  { %1722 = vmatprep.subr.bf16.mxu0 %v1878_v4 }
 0x4dd   :  { %1724 = vmatpush3.bf16.msra.mxu0 %v2012_v27 }
 0x4de   :  { %1725 = vmatprep.subr.bf16.mxu0 %v1878_v4 }
 0x4e1   :  { %1727 = vmatpush3.bf16.msra.mxu0 %v2018_v30 }
 0x4e2   :  { %1728 = vmatprep.subr.bf16.mxu0 %v1878_v4 }
 0x4e5   :  { %1730 = vmatpush3.bf16.msra.mxu0 %v2024_v33 }
 0x549   :  { %v837_v14 = vpop.permute.xlu0 %836 }
 0x54a   :  { %vm838_vm2 = vcmp.eq.s32.totalorder %v837_v14, 1 }
 0x59b   :  { %v725_v7 = vpop.f32.mrb[6].mxu0 }
 0x59c   :  { %v730_v9 = vrot.slane %v725_v7, 1  ;;  %v1433_v16 = vpop.f32.mrb[7].mxu0  ;;  %v733_v60 = vadd.f32 %v725_v7, %v657_v21 }
 0x59e   :  { %v734_v27 = vadd.f32 %v730_v9, %v658_v24 }
 0x5a0   :  { %1789 = vtanh.f32 %v734_v27 }
 0x5a1   :  { %1791 = vtanh.f32 %v733_v60 }
 0x5aa   :  { %v1790_v30 = vpop.eup %1789 }
 0x5ab   :  { %v747_v62 = vrot.slane %v1790_v30, 7  ;;  %v1792_v4 = vpop.eup %1791 }
 0x5ad   :  { %v748_v33 = vsel %vm277_vm5, %v747_v62, %v1792_v4 }
 0x5ae   :  { %v750_v63 = vsel %vm744_vm0, %v748_v33, %v656_v59  ;;  %1467 = vmatmul.mubr.f32.vlgmr.msra.gmra.mrb[6].mxu1 %v748_v33 }
 0x681   :  { %v819_v2 = vpop.f32.mrb[6].mxu1 }
 0x682   :  { %v824_v3 = vrot.slane %v819_v2, 1  ;;  %v1468_v6 = vpop.f32.mrb[7].mxu1  ;;  %v827_v12 = vadd.f32 %v819_v2, %v751_v10 }
 0x684   :  { %v828_v13 = vadd.f32 %v824_v3, %v752_v11 }
 0x686   :  { %1793 = vtanh.f32 %v828_v13 }
 0x687   :  { %1795 = vtanh.f32 %v827_v12 }
 0x690   :  { %v1794_v15 = vpop.eup %1793 }
 0x691   :  { %v841_v18 = vrot.slane %v1794_v15, 7  ;;  %v1796_v19 = vpop.eup %1795 }
 0x693   :  { %v842_v20 = vsel %vm277_vm5, %v841_v18, %v1796_v19 }
 0x694   :  { %v844_v17 = vsel %vm838_vm2, %v842_v20, %v750_v63  ;;  %1502 = vmatmul.mubr.f32.vlgmr.msra.gmra.mrb[8].mxu0 %v842_v20 }
 0x767   :  { %v913_v8 = vpop.f32.mrb[8].mxu0 }
 0x768   :  { %v918_v22 = vrot.slane %v913_v8, 1  ;;  %v1503_v23 = vpop.f32.mrb[9].mxu0  ;;  %v921_v28 = vadd.f32 %v913_v8, %v845_v25 }
 0x76a   :  { %v922_v29 = vadd.f32 %v918_v22, %v846_v26 }
 0x76c   :  { %1797 = vtanh.f32 %v922_v29 }
 0x76d   :  { %1799 = vtanh.f32 %v921_v28 }
 0x776   :  { %v1798_v31 = vpop.eup %1797 }
 0x777   :  { %v935_v34 = vrot.slane %v1798_v31, 7  ;;  %v1800_v35 = vpop.eup %1799 }
 0x779   :  { %v936_v36 = vsel %vm277_vm5, %v935_v34, %v1800_v35 }
 0x77a   :  { %v938_v37 = vsel %vm932_vm3, %v936_v36, %v844_v17  ;;  %939 = vst [vmem:[#allocation3] sm:$0x3] %v936_v36 }
 0x77b   :  { %940 = vst [vmem:[#allocation4] sm:$0x3] %v938_v37 }
 0x77c PF:  { %v945_v38 = vld [vmem:[#allocation10] sm:$0xff]  ;;  %v946_v39 = vld [vmem:[#allocation10 + $0x8] sm:$0xff]  ;;  %v947_v40 = vld [vmem:[#allocation10 + $0x10] sm:$0xff]  ;;  %v1882_v41 = vmov 0.0|0.0   ;;  %vm1883_vm4 = vmmov 0   ;;  %s1884_s16 = smov [#allocation12]  }
 0x77d   :  { %1731 = vmatprep.subr.bf16.mxu0 %v1882_v41  ;;  %v1732_v42 = vpack.c.bf16 %v946_v39, %v945_v38  ;;  %v948_v43 = vld [vmem:[#allocation10 + $0x18] sm:$0xff]  ;;  %1536 = vmatprep.mubr.msk.f32.mxu0 %vm1883_vm4, %v1877_v0  ;;  %v949_v45 = vld [vmem:[#allocation10 + $0x20] sm:$0xff]  ;;  %v950_v46 = vld [vmem:[#allocation10 + $0x28] sm:$0xff]  ;;  %s1045_s17 = sshll.u32 %s1884_s16, 4  ;;  %s1046_s17 = int_to_ptr.vmem [resolvable:$true] %s1045_s17 }
 0x77e   :  { %v1735_v44 = vpack.c.bf16 %v948_v43, %v947_v40  ;;  %v1738_v47 = vpack.c.bf16 %v950_v46, %v949_v45  ;;  %v951_v48 = vld [vmem:[#allocation10 + $0x30] sm:$0xff]  ;;  %v952_v49 = vld [vmem:[#allocation10 + $0x38] sm:$0xff]  ;;  %v953_v51 = vld [vmem:[#allocation10 + $0x40] sm:$0xff]  ;;  %s1845_s18 = scalar_lea.vmem %s1046_s17, 32  ;;  %p1850_p4 = scmp.lt.s32.totalorder %s1046_s17, %s1046_s17 }
 0x77f   :  { %1733 = vmatpush3.bf16.msra.mxu0 %v1732_v42  ;;  %v1741_v50 = vpack.c.bf16 %v952_v49, %v951_v48  ;;  %v954_v52 = vld [vmem:[#allocation10 + $0x48] sm:$0xff]  ;;  %v955_v54 = vld [vmem:[#allocation10 + $0x50] sm:$0xff]  ;;  %v956_v0 = vld [vmem:[#allocation10 + $0x58] sm:$0xff]  ;;  %p1846_p3 = scmp.ne.s32.totalorder %s1046_s17, %s1845_s18  ;;  %p1851_p5 = scmp.lt.s32.totalorder %s1845_s18, %s1845_s18 }
 0x780   :  { %1734 = vmatprep.subr.bf16.mxu0 %v1882_v41  ;;  %v1744_v53 = vpack.c.bf16 %v954_v52, %v953_v51  ;;  %v1747_v55 = vpack.c.bf16 %v956_v0, %v955_v54  ;;  %v957_v56 = vld [vmem:[#allocation10 + $0x60] sm:$0xff]  ;;  %v958_v57 = vld [vmem:[#allocation10 + $0x68] sm:$0xff]  ;;  %v959_v59 = vld [vmem:[#allocation10 + $0x70] sm:$0xff] }
 0x781   :  { %v1750_v58 = vpack.c.bf16 %v958_v57, %v957_v56  ;;  %v960_v5 = vld [vmem:[#allocation10 + $0x78] sm:$0xff]  ;;  %v1062_v16 = vld [vmem:[%s2189_s7] ss:$0 sm:$0xff]  ;;  %p1852_p6 = por %p1851_p5, %p1850_p4 }
 0x782   :  { %v1753_v7 = vpack.c.bf16 %v960_v5, %v959_v59  ;;  %v944_v9 = vld [vmem:[#allocation4] sm:$0x3] }
 0x783   :  { %1736 = vmatpush3.bf16.msra.mxu0 %v1735_v44  ;;  %p1853_p7 = pnand %p1852_p6, %p1846_p3 }
 0x784   :  { %1737 = vmatprep.subr.bf16.mxu0 %v1882_v41 }
 0x787   :  { %1739 = vmatpush3.bf16.msra.mxu0 %v1738_v47 }
 0x788   :  { %1740 = vmatprep.subr.bf16.mxu0 %v1882_v41 }
 0x78b   :  { %1742 = vmatpush3.bf16.msra.mxu0 %v1741_v50 }
 0x78c   :  { %1743 = vmatprep.subr.bf16.mxu0 %v1882_v41 }
 0x78f   :  { %1745 = vmatpush3.bf16.msra.mxu0 %v1744_v53 }
 0x790   :  { %1746 = vmatprep.subr.bf16.mxu0 %v1882_v41 }
 0x793   :  { %1748 = vmatpush3.bf16.msra.mxu0 %v1747_v55 }
 0x794   :  { %1749 = vmatprep.subr.bf16.mxu0 %v1882_v41 }
 0x797   :  { %1751 = vmatpush3.bf16.msra.mxu0 %v1750_v58 }
 0x798   :  { %1752 = vmatprep.subr.bf16.mxu0 %v1882_v41 }
 0x79b   :  { %1754 = vmatpush3.bf16.msra.mxu0 %v1753_v7 }
 0x79e   :  { %1537 = vmatmul.mubr.f32.vlgmr.msra.gmra.mrb[0].mxu0 %v944_v9 }
 0x871   :  { %v1034_v21 = vpop.f32.mrb[0].mxu0 }
 0x872   :  { %v1035_v24 = vadd.f32 %v1062_v16, %v1034_v21  ;;  %v1538_v60 = vpop.f32.mrb[1].mxu0 }
 0x874   :  { %1038 = vst [vmem:[#allocation12] sm:$0x3] %v1035_v24 }
 0x875   :  { %1856 = shalt.err (!%p1853_p7)
}
 0x876   :  { %s1857_s21 = scalar_lea.hbm %s2190_s8, 32 }
 0x877   :  { %p1858_p8 = scmp.ne.s32.totalorder %s2190_s8, %s1857_s21  ;;  %p1861_p9 = scmp.lt.u32.totalorder %s1857_s21, %s2190_s8 }
 0x879   :  { %p1863_p10 = pnand %p1861_p9, %p1858_p8 }
 0x87b   :  { %1866 = shalt.err (!%p1863_p10)
}
 0x87c   :  { %1048 = dma.vmem_to_hbm [thread:$0]  %s1046_s17, 32, %s2190_s8, [#allocation9]  }
 0x87d   :  { %1871 = dma.done.wait [#allocation9], 32  }
 0x87e   :  { %1872 = vsyncadd [#allocation9], 4294967264 }
 0x87f   :  { %1052 = vsyncpa [#allocation8], 1 }
 0x880   :  { %1053 = vsyncpa [#allocation11], 1 }
 0x881   :  { %1054 = vsyncpa [#allocation9], 1 }

</bundles_post_ra>
